<compile_context>
chip_gen: v5e
topology: v5e:2x2
jax: 0.10.0
libtpu: 0.0.40
codegen_flags: <defaults>
</compile_context>

<pallas_src>
import math
from functools import partial

import jax
import jax.numpy as jnp
from jax.experimental import pallas as pl
from jax.experimental.pallas import tpu as pltpu


# --------------------------------------------------------------------------
# Tiling / VMEM helpers
# --------------------------------------------------------------------------
def _pick_lane_tile(dim, target):
    """Tile for a lane (last) block dim: multiple of 128 dividing dim, else full dim."""
    if dim <= target:
        return dim
    t = (target // 128) * 128
    while t >= 128:
        if dim % t == 0:
            return t
        t -= 128
    return dim


def _pick_sublane_tile(dim, target):
    """Tile for a sublane (2nd-last) block dim: multiple of 8 dividing dim, else full dim."""
    if dim <= target:
        return dim
    t = (target // 8) * 8
    while t >= 8:
        if dim % t == 0:
            return t
        t -= 8
    return dim


def _vmem_limit_bytes():
    """~half of physical VMEM: 64MiB on v5e/v6e (128MiB), 32MiB on v7x (64MiB)."""
    try:
        cap = int(pltpu.get_tpu_info().vmem_capacity_bytes)
    except Exception:
        cap = 64 * 1024 * 1024
    return cap // 2


# --------------------------------------------------------------------------
# Kernel 1: fc projection  h @ W -> ft, with el/er fused into the epilogue
#   grid = (src row tiles, k tiles), k last ("arbitrary")
# --------------------------------------------------------------------------
def fc_kernel(h_ref, w_ref, al_ref, ar_ref, ft_ref, el_ref, er_ref, acc_ref):
    k = pl.program_id(1)

    @pl.when(k == 0)
    def _():
        acc_ref[...] = jnp.zeros(acc_ref.shape, acc_ref.dtype)

    acc_ref[...] += jnp.dot(h_ref[...], w_ref[...],
                            preferred_element_type=jnp.float32)

    @pl.when(k == pl.num_programs(1) - 1)
    def _():
        acc = acc_ref[...]
        ft_ref[...] = acc.astype(ft_ref.dtype)
        # Fused per-node attention terms (block-diagonal attn_l / attn_r),
        # src-major (tm, H); the wrapper does a tiny layout fix-up.
        el_ref[...] = jnp.dot(acc, al_ref[...], preferred_element_type=jnp.float32)
        er_ref[...] = jnp.dot(acc, ar_ref[...], preferred_element_type=jnp.float32)


# --------------------------------------------------------------------------
# Kernel 2: online-softmax GAT attention + aggregation
#   grid = (dst tiles ["parallel"], src tiles ["arbitrary", last])
# --------------------------------------------------------------------------
def gat_attn_kernel(alpha, H, D,
                    adj_ref, ft_ref, el_ref, er_ref, bias_ref,
                    out_ref, m_sc, l_sc, acc_sc):
    s_idx = pl.program_id(1)

    @pl.when(s_idx == 0)
    def _():
        m_sc[...] = jnp.full(m_sc.shape, -1e30, dtype=m_sc.dtype)
        l_sc[...] = jnp.zeros(l_sc.shape, l_sc.dtype)
        acc_sc[...] = jnp.zeros(acc_sc.shape, acc_sc.dtype)

    valid = adj_ref[...] > 0                               # caller dtype, no wrapper cast
    ft_bf = ft_ref[...].astype(jnp.bfloat16)               # one cast per step (item 4)
    neg_big = jnp.float32(-1e30)

    # NOTE: fully-masked dst rows would be 0/0 (NaN) in the reference; the -1e30
    # masking makes them a finite uniform average instead. Self-loops are assumed.
    for g in range(H):
        el_row = el_ref[g:g + 1, :]                        # (1, tile_src)   lane-dense
        er_col = er_ref[:, g:g + 1]                        # (tile_dst, 1)
        e = er_col + el_row                                # (tile_dst, tile_src)
        e = jnp.where(e > 0, e, alpha * e)                 # leaky_relu
        e = jnp.where(valid, e, neg_big)                   # mask invalid edges

        m_prev = m_sc[:, g:g + 1]
        m_new = jnp.maximum(m_prev, jnp.max(e, axis=-1, keepdims=True))
        corr = jnp.exp(m_prev - m_new)                     # rescale of running state
        # TODO(synk): bf16 exp on v6e/v7x (~2x EUP throughput) if precision allows.
        p = jnp.exp(e - m_new)                             # masked entries -> 0

        l_sc[:, g:g + 1] = corr * l_sc[:, g:g + 1] + jnp.sum(p, axis=-1, keepdims=True)
        # bf16 x bf16 -> f32 accumulate aggregation matmul (flash-attention recipe)
        acc_sc[:, g * D:(g + 1) * D] = (
            corr * acc_sc[:, g * D:(g + 1) * D]
            + jnp.dot(p.astype(jnp.bfloat16), ft_bf[:, g * D:(g + 1) * D],
                      preferred_element_type=jnp.float32))
        m_sc[:, g:g + 1] = m_new

    @pl.when(s_idx == pl.num_programs(1) - 1)
    def _():
        # exact per-head normalization in scratch, then ONE lane-dense store
        for g in range(H):
            acc_sc[:, g * D:(g + 1) * D] = (
                acc_sc[:, g * D:(g + 1) * D] / l_sc[:, g:g + 1])
        out_ref[...] = acc_sc[...] + bias_ref[...]


# --------------------------------------------------------------------------
# Wrapper
# --------------------------------------------------------------------------
def gat_nodeflow_forward(h, adj, w_fc, attn_l, attn_r, ret_bias,
                         *, num_heads, out_dim, alpha=0.2,
                         tile_src=None, tile_dst=None):
    N_src, in_dim = h.shape
    N_dst = adj.shape[0]
    H, D = num_heads, out_dim
    HD = H * D
    assert w_fc.shape == (in_dim, HD)
    assert N_dst <= N_src, "NodeFlow dst layer = first N_dst src nodes"

    vmem_limit = _vmem_limit_bytes()

    # ---------------- Kernel 1: fc + fused el/er ----------------
    tm = _pick_sublane_tile(N_src, 512 if HD <= 1024 else 256)
    tk = _pick_lane_tile(in_dim, 512)
    assert N_src % tm == 0 and in_dim % tk == 0

    # block-diagonal attn vectors: al_bd[(h,d), k] = attn_l[h, d] * (h == k)
    eye_h = jnp.eye(H, dtype=w_fc.dtype)
    al_bd = jnp.einsum('hd,hk->hdk', attn_l, eye_h).reshape(HD, H)
    ar_bd = jnp.einsum('hd,hk->hdk', attn_r, eye_h).reshape(HD, H)

    # TODO(synk): optional bf16 h/w_fc inputs (f32 accumulate) if tolerance allows.
    fc_cost = pl.CostEstimate(
        flops=2 * N_src * in_dim * HD + 4 * N_src * HD * H,
        transcendentals=0,
        bytes_accessed=4 * (N_src * in_dim + in_dim * HD + N_src * HD + 2 * N_src * H))

    ft_flat, el_sm, er_sm = pl.pallas_call(
        fc_kernel,
        out_shape=(jax.ShapeDtypeStruct((N_src, HD), jnp.float32),
                   jax.ShapeDtypeStruct((N_src, H), jnp.float32),
                   jax.ShapeDtypeStruct((N_src, H), jnp.float32)),
        grid=(N_src // tm, in_dim // tk),
        in_specs=[pl.BlockSpec((tm, tk), lambda i, k: (i, k)),     # h
                  pl.BlockSpec((tk, HD), lambda i, k: (k, 0)),     # w_fc
                  pl.BlockSpec((HD, H), lambda i, k: (0, 0)),      # attn_l block-diag
                  pl.BlockSpec((HD, H), lambda i, k: (0, 0))],     # attn_r block-diag
        out_specs=[pl.BlockSpec((tm, HD), lambda i, k: (i, 0)),    # ft
                   pl.BlockSpec((tm, H), lambda i, k: (i, 0)),     # el (src-major)
                   pl.BlockSpec((tm, H), lambda i, k: (i, 0))],    # er (src-major)
        scratch_shapes=[pltpu.VMEM((tm, HD), jnp.float32)],
        compiler_params=pltpu.CompilerParams(
            dimension_semantics=("parallel", "arbitrary"),
            vmem_limit_bytes=vmem_limit),
        cost_estimate=fc_cost,
    )(h, w_fc, al_bd, ar_bd)

    # tiny layout fix-ups (H*N_src*4 bytes, negligible vs. re-reading ft_flat):
    el_hm = el_sm.T            # head-major (H, N_src): lane-dense rows over src
    er_dm = er_sm[:N_dst]      # dst-major (N_dst, H): dst nodes = first N_dst src rows

    # ---------------- Kernel 2: online-softmax attention ----------------
    if tile_dst is None:
        tile_dst = _pick_sublane_tile(N_dst, 256 if HD <= 2048 else 128)
        if N_dst // tile_dst == 1 and N_dst % 16 == 0:
            tile_dst //= 2     # >= 2 parallel dst steps for v7x's 2 TensorCores
    if tile_src is None:
        tile_src = _pick_lane_tile(N_src, 512 if HD <= 1024 else 256)
    assert N_dst % tile_dst == 0 and (tile_dst % 8 == 0 or tile_dst == N_dst)
    assert N_src % tile_src == 0 and (tile_src % 128 == 0 or tile_src == N_src)
    num_dst_tiles = N_dst // tile_dst
    num_src_tiles = N_src // tile_src
    # TODO(synk): head-group tiling of the H*D axis for very large H*D (>4096).

    bias2d = ret_bias.reshape(1, HD)

    attn_cost = pl.CostEstimate(
        flops=2 * N_dst * N_src * HD + 8 * N_dst * N_src * H,
        transcendentals=N_dst * N_src * H + 2 * N_dst * H * num_src_tiles,
        bytes_accessed=(adj.dtype.itemsize * N_dst * N_src
                        + 4 * N_src * HD * num_dst_tiles
                        + 4 * H * N_src * num_dst_tiles
                        + 4 * N_dst * H + 4 * N_dst * HD))

    ret = pl.pallas_call(
        partial(gat_attn_kernel, alpha, H, D),
        out_shape=jax.ShapeDtypeStruct((N_dst, HD), jnp.float32),
        grid=(num_dst_tiles, num_src_tiles),
        in_specs=[
            pl.BlockSpec((tile_dst, tile_src), lambda i, s: (i, s)),   # adj tile
            pl.BlockSpec((tile_src, HD), lambda i, s: (s, 0)),         # ft src tile
            pl.BlockSpec((H, tile_src), lambda i, s: (0, s)),          # el head-major
            pl.BlockSpec((tile_dst, H), lambda i, s: (i, 0)),          # er dst-major
            pl.BlockSpec((1, HD), lambda i, s: (0, 0)),                # ret_bias
        ],
        out_specs=pl.BlockSpec((tile_dst, HD), lambda i, s: (i, 0)),
        scratch_shapes=[pltpu.VMEM((tile_dst, H), jnp.float32),        # running max
                        pltpu.VMEM((tile_dst, H), jnp.float32),        # running sum
                        pltpu.VMEM((tile_dst, HD), jnp.float32)],      # running acc
        compiler_params=pltpu.CompilerParams(
            dimension_semantics=("parallel", "arbitrary"),
            vmem_limit_bytes=vmem_limit),
        cost_estimate=attn_cost,
    )(adj, ft_flat, el_hm, er_dm, bias2d)

    # aggregate == 'concat': already (N_dst, H*D), no transpose needed.
    # TODO(synk): feat_drop/attn_drop are identity here; residual path and
    # activation are disabled in the default module configuration.
    return ret


# --------------------------------------------------------------------------
# Pure-JAX reference (f32 throughout) for correctness checking
# --------------------------------------------------------------------------
def ref_forward(h, adj, w_fc, attn_l, attn_r, ret_bias, *, num_heads, out_dim, alpha=0.2):
    H, D = num_heads, out_dim
    N_dst = adj.shape[0]
    ft = (h @ w_fc).reshape(h.shape[0], H, D)
    ft_dst = ft[:N_dst]
    el = jnp.einsum('nhd,hd->nh', ft, attn_l)
    er = jnp.einsum('mhd,hd->mh', ft_dst, attn_r)
    e = er[:, None, :] + el[None, :, :]
    e = jnp.where(e > 0, e, alpha * e)
    s = jnp.exp(e) * adj[:, :, None]
    norm = s.sum(axis=1)
    agg = jnp.einsum('mnh,nhd->mhd', s, ft)
    ret = agg / norm[:, :, None] + ret_bias[None]
    return ret.reshape(N_dst, H * D)


if __name__ == "__main__":
    def run_case(key, N_src, N_dst, in_dim, out_dim, num_heads, **tiles):
        alpha = 0.2
        k_h, k_w, k_al, k_ar, k_adj = jax.random.split(key, 5)

        gain = math.sqrt((in_dim + num_heads * out_dim) / (in_dim + out_dim))
        bound_fc = gain * math.sqrt(6.0 / (in_dim + num_heads * out_dim))
        w_fc = jax.random.uniform(k_w, (in_dim, num_heads * out_dim),
                                  jnp.float32, -bound_fc, bound_fc)
        bound_a = math.sqrt(6.0 / (1 + out_dim))
        attn_l = jax.random.uniform(k_al, (num_heads, out_dim), jnp.float32, -bound_a, bound_a)
        attn_r = jax.random.uniform(k_ar, (num_heads, out_dim), jnp.float32, -bound_a, bound_a)
        ret_bias = jnp.zeros((num_heads, out_dim), jnp.float32)        # fill_(0)

        h = jax.random.normal(k_h, (N_src, in_dim), jnp.float32)
        adj = jax.random.bernoulli(k_adj, 0.4, (N_dst, N_src)).astype(jnp.float32)
        adj = jnp.maximum(adj, jnp.eye(N_dst, N_src, dtype=jnp.float32))   # self-loops

        ret = gat_nodeflow_forward(h, adj, w_fc, attn_l, attn_r, ret_bias,
                                   num_heads=num_heads, out_dim=out_dim,
                                   alpha=alpha, **tiles)
        ret = jax.block_until_ready(ret)

        expected = ref_forward(h, adj, w_fc, attn_l, attn_r, ret_bias,
                               num_heads=num_heads, out_dim=out_dim, alpha=alpha)
        assert ret.shape == (N_dst, num_heads * out_dim)
        # bf16 aggregation matmuls (f32 accumulate) -> compare at a matching tolerance
        err = float(jnp.max(jnp.abs(ret - expected)))
        assert jnp.allclose(ret, expected, atol=3e-2, rtol=3e-2), f"max abs err {err}"

    k0, k1 = jax.random.split(jax.random.PRNGKey(0), 2)
    # tiny single-tile case (module-consistent small shapes)
    run_case(k0, N_src=16, N_dst=8, in_dim=32, out_dim=16, num_heads=4)
    # multi dst/src-tile case exercising the online-softmax accumulation path
    run_case(k1, N_src=256, N_dst=64, in_dim=64, out_dim=32, num_heads=4,
             tile_src=128, tile_dst=32)

    print("KERNEL_OK")
</pallas_src>

<mosaic_0001>
module attributes {stable_mosaic.version = 11 : i64} {
  func.func @fc_kernel(%arg0: i32, %arg1: i32, %arg2: memref<16x32xf32, #tpu.memory_space<vmem>>, %arg3: memref<32x64xf32, #tpu.memory_space<vmem>>, %arg4: memref<64x4xf32, #tpu.memory_space<vmem>>, %arg5: memref<64x4xf32, #tpu.memory_space<vmem>>, %arg6: memref<16x64xf32, #tpu.memory_space<vmem>>, %arg7: memref<16x4xf32, #tpu.memory_space<vmem>>, %arg8: memref<16x4xf32, #tpu.memory_space<vmem>>, %arg9: memref<16x64xf32, #tpu.memory_space<vmem>>) attributes {dimension_semantics = [#tpu.dimension_semantics<parallel>, #tpu.dimension_semantics<arbitrary>], iteration_bounds = array<i64: 1, 1>, scalar_prefetch = 0 : i64, scratch_operands = 1 : i64, tpu.core_type = #tpu.core_type<tc>, window_params = [{transform_indices = @transform_0, window_bounds = array<i64: 16, 32>}, {transform_indices = @transform_1, window_bounds = array<i64: 32, 64>}, {pipeline_mode = #tpu.pipeline_mode<synchronous>, transform_indices = @transform_2, window_bounds = array<i64: 64, 4>}, {pipeline_mode = #tpu.pipeline_mode<synchronous>, transform_indices = @transform_3, window_bounds = array<i64: 64, 4>}, {transform_indices = @transform_4, window_bounds = array<i64: 16, 64>}, {transform_indices = @transform_5, window_bounds = array<i64: 16, 4>}, {transform_indices = @transform_6, window_bounds = array<i64: 16, 4>}]} {
    %c0_i32 = arith.constant 0 : i32
    %0 = arith.cmpi eq, %arg1, %c0_i32 : i32
    %1 = arith.extui %0 : i1 to i32
    %c0_i32_0 = arith.constant 0 : i32
    %2 = arith.cmpi ne, %1, %c0_i32_0 : i32
    scf.if %2 {
      %cst_10 = arith.constant 0.000000e+00 : f32
      %12 = vector.broadcast %cst_10 : f32 to vector<16x64xf32>
      %c0_11 = arith.constant 0 : index
      %c0_12 = arith.constant 0 : index
      %13 = vector.load %arg9[%c0_11, %c0_12] : memref<16x64xf32, #tpu.memory_space<vmem>>, vector<16x64xf32>
      tpu.vector_store %arg9[%c0_11, %c0_12], %12 {strides = array<i32>} : memref<16x64xf32, #tpu.memory_space<vmem>>, vector<16x64xf32>,
    } else {
    }
    %c0 = arith.constant 0 : index
    %c0_1 = arith.constant 0 : index
    %3 = vector.load %arg9[%c0, %c0_1] : memref<16x64xf32, #tpu.memory_space<vmem>>, vector<16x64xf32>
    %c0_2 = arith.constant 0 : index
    %c0_3 = arith.constant 0 : index
    %4 = vector.load %arg2[%c0_2, %c0_3] : memref<16x32xf32, #tpu.memory_space<vmem>>, vector<16x32xf32>
    %c0_4 = arith.constant 0 : index
    %c0_5 = arith.constant 0 : index
    %5 = vector.load %arg3[%c0_4, %c0_5] : memref<32x64xf32, #tpu.memory_space<vmem>>, vector<32x64xf32>
    %cst = arith.constant dense<0.000000e+00> : vector<16x64xf32>
    %6 = tpu.matmul %4, %5, %cst {dimension_numbers = #tpu.dot_dimension_numbers<[1], [0], [0], [1], [0, 0, 1, 1], [], []>} : vector<16x32xf32>, vector<32x64xf32>, vector<16x64xf32> -> vector<16x64xf32>
    %7 = arith.addf %3, %6 : vector<16x64xf32>
    %c0_6 = arith.constant 0 : index
    %c0_7 = arith.constant 0 : index
    %8 = vector.load %arg9[%c0_6, %c0_7] : memref<16x64xf32, #tpu.memory_space<vmem>>, vector<16x64xf32>
    tpu.vector_store %arg9[%c0_6, %c0_7], %7 {strides = array<i32>} : memref<16x64xf32, #tpu.memory_space<vmem>>, vector<16x64xf32>,
    %c0_i32_8 = arith.constant 0 : i32
    %9 = arith.cmpi eq, %arg1, %c0_i32_8 : i32
    %10 = arith.extui %9 : i1 to i32
    %c0_i32_9 = arith.constant 0 : i32
    %11 = arith.cmpi ne, %10, %c0_i32_9 : i32
    scf.if %11 {
      %c0_10 = arith.constant 0 : index
      %c0_11 = arith.constant 0 : index
      %12 = vector.load %arg9[%c0_10, %c0_11] : memref<16x64xf32, #tpu.memory_space<vmem>>, vector<16x64xf32>
      %c0_12 = arith.constant 0 : index
      %c0_13 = arith.constant 0 : index
      %13 = vector.load %arg6[%c0_12, %c0_13] : memref<16x64xf32, #tpu.memory_space<vmem>>, vector<16x64xf32>
      tpu.vector_store %arg6[%c0_12, %c0_13], %12 {strides = array<i32>} : memref<16x64xf32, #tpu.memory_space<vmem>>, vector<16x64xf32>,
      %c0_14 = arith.constant 0 : index
      %c0_15 = arith.constant 0 : index
      %14 = vector.load %arg4[%c0_14, %c0_15] : memref<64x4xf32, #tpu.memory_space<vmem>>, vector<64x4xf32>
      %cst_16 = arith.constant dense<0.000000e+00> : vector<16x4xf32>
      %15 = tpu.matmul %12, %14, %cst_16 {dimension_numbers = #tpu.dot_dimension_numbers<[1], [0], [0], [1], [0, 0, 1, 1], [], []>} : vector<16x64xf32>, vector<64x4xf32>, vector<16x4xf32> -> vector<16x4xf32>
      %c0_17 = arith.constant 0 : index
      %c0_18 = arith.constant 0 : index
      %16 = vector.load %arg7[%c0_17, %c0_18] : memref<16x4xf32, #tpu.memory_space<vmem>>, vector<16x4xf32>
      tpu.vector_store %arg7[%c0_17, %c0_18], %15 {strides = array<i32>} : memref<16x4xf32, #tpu.memory_space<vmem>>, vector<16x4xf32>,
      %c0_19 = arith.constant 0 : index
      %c0_20 = arith.constant 0 : index
      %17 = vector.load %arg5[%c0_19, %c0_20] : memref<64x4xf32, #tpu.memory_space<vmem>>, vector<64x4xf32>
      %cst_21 = arith.constant dense<0.000000e+00> : vector<16x4xf32>
      %18 = tpu.matmul %12, %17, %cst_21 {dimension_numbers = #tpu.dot_dimension_numbers<[1], [0], [0], [1], [0, 0, 1, 1], [], []>} : vector<16x64xf32>, vector<64x4xf32>, vector<16x4xf32> -> vector<16x4xf32>
      %c0_22 = arith.constant 0 : index
      %c0_23 = arith.constant 0 : index
      %19 = vector.load %arg8[%c0_22, %c0_23] : memref<16x4xf32, #tpu.memory_space<vmem>>, vector<16x4xf32>
      tpu.vector_store %arg8[%c0_22, %c0_23], %18 {strides = array<i32>} : memref<16x4xf32, #tpu.memory_space<vmem>>, vector<16x4xf32>,
    } else {
    }
    return
  }
  func.func @transform_0(%arg0: i32, %arg1: i32) -> (i32, i32) {
    %c0_i32 = arith.constant 0 : i32
    return %arg0, %arg1 : i32, i32
  }
  func.func @transform_1(%arg0: i32, %arg1: i32) -> (i32, i32) {
    %c0_i32 = arith.constant 0 : i32
    %c0_i32_0 = arith.constant 0 : i32
    return %arg1, %c0_i32 : i32, i32
  }
  func.func @transform_2(%arg0: i32, %arg1: i32) -> (i32, i32) {
    %c0_i32 = arith.constant 0 : i32
    %c0_i32_0 = arith.constant 0 : i32
    %c0_i32_1 = arith.constant 0 : i32
    return %c0_i32, %c0_i32_0 : i32, i32
  }
  func.func @transform_3(%arg0: i32, %arg1: i32) -> (i32, i32) {
    %c0_i32 = arith.constant 0 : i32
    %c0_i32_0 = arith.constant 0 : i32
    %c0_i32_1 = arith.constant 0 : i32
    return %c0_i32, %c0_i32_0 : i32, i32
  }
  func.func @transform_4(%arg0: i32, %arg1: i32) -> (i32, i32) {
    %c0_i32 = arith.constant 0 : i32
    %c0_i32_0 = arith.constant 0 : i32
    return %arg0, %c0_i32 : i32, i32
  }
  func.func @transform_5(%arg0: i32, %arg1: i32) -> (i32, i32) {
    %c0_i32 = arith.constant 0 : i32
    %c0_i32_0 = arith.constant 0 : i32
    return %arg0, %c0_i32 : i32, i32
  }
  func.func @transform_6(%arg0: i32, %arg1: i32) -> (i32, i32) {
    %c0_i32 = arith.constant 0 : i32
    %c0_i32_0 = arith.constant 0 : i32
    return %arg0, %c0_i32 : i32, i32
  }
}

</mosaic_0001>

<bundles_post_ra>
// kernel: tpu_custom_call.1
= control target key start
LH: loop header
LB: loop body
LE: loop exit
PB: predicated region body
PF: predicated region fallthrough
CT: control target
= control target key end

     0   :  { %vm25_vm0 = vcmask 523264   ;;  %v221_v3 = vmov 0.0   ;;  %s351_s0 = inlined_call_operand.vmem [shape: f32[16,32], index: 0, kind: input, shape index: {}]   ;;  %s352_s1 = inlined_call_operand.vmem [shape: f32[32,64], index: 1, kind: input, shape index: {}]   ;;  %s353_s2 = inlined_call_operand.vmem [shape: f32[64,4], index: 2, kind: input, shape index: {}]   ;;  %s354_s3 = inlined_call_operand.vmem [shape: f32[64,4], index: 3, kind: input, shape index: {}]   ;;  %s355_s4 = inlined_call_operand.hbm [shape: f32[16,64], index: 4, kind: output, shape index: {0}]   ;;  %s356_s5 = inlined_call_operand.vmem [shape: f32[16,4], index: 5, kind: output, shape index: {1}]   ;;  %s357_s6 = inlined_call_operand.vmem [shape: f32[16,4], index: 6, kind: output, shape index: {2}]  }
   0x1   :  { %v35_v0 = vld [vmem:[%s352_s1 + $0x18] sm:$0xff]  ;;  %v34_v1 = vld [vmem:[%s352_s1 + $0x10] sm:$0xff]  ;;  %v33_v2 = vld [vmem:[%s352_s1 + $0x8] sm:$0xff]  ;;  %26 = vst.msk [vmem:[#allocation2] sm:$0xff] %vm25_vm0, %v221_v3 }
   0x2   :  { %55 = vmatpush.msra.mxu0 %v35_v0  ;;  %v85_v4 = vld [vmem:[%s353_s2 + $0x38] sm:$0xff]  ;;  %v84_v6 = vld [vmem:[%s353_s2 + $0x30] sm:$0xff]  ;;  %27 = vst.msk [vmem:[#allocation2 + $0x8] sm:$0xff] %vm25_vm0, %v221_v3 }
   0x3   :  { %v125_v5 = vld [vmem:[%s354_s3 + $0x38] sm:$0xff]  ;;  %100 = vmatpush.msra.mxu1 %v85_v4  ;;  %v124_v7 = vld [vmem:[%s354_s3 + $0x30] sm:$0xff] }
   0x4   :  { %56 = vmatpush.msra.mxu0 %v34_v1 }
   0x5   :  { %12 = vsyncpa [#allocation4], 0  ;;  %v32_v8 = vld [vmem:[%s352_s1] sm:$0xff]  ;;  %134 = vmatpush.msra.mxu2 %v125_v5  ;;  %183 = vmatpush.msra.mxu3 %v85_v4  ;;  %vm36_vm1 = vcmask 261120   ;;  %v31_v10 = vld [vmem:[%s351_s0 + $0x8] sm:$0xff]  ;;  %s157_s17 = sshll.u32 %s355_s4, 4  ;;  %s158_s17 = int_to_ptr.hbm [resolvable:$true] %s157_s17 }
   0x6   :  { %57 = vmatpush.msra.mxu0 %v33_v2  ;;  %v30_v9 = vld [vmem:[%s351_s0] sm:$0xff]  ;;  %101 = vmatpush.msra.mxu1 %v84_v6  ;;  %v83_v11 = vld [vmem:[%s353_s2 + $0x28] sm:$0xff]  ;;  %v81_v15 = vld [vmem:[%s353_s2 + $0x18] sm:$0xff]  ;;  %s223_s1 = smov 128   ;;  %s224_s18 = smov 8   ;;  %vm115_vm2 = vcmask 31744  }
   0x7   :  { %135 = vmatpush.msra.mxu2 %v124_v7  ;;  %184 = vmatpush.msra.mxu3 %v84_v6  ;;  %v123_v12 = vld [vmem:[%s354_s3 + $0x28] sm:$0xff]  ;;  %v82_v13 = vld [vmem:[%s353_s2 + $0x20] sm:$0xff]  ;;  %v121_v16 = vld [vmem:[%s354_s3 + $0x18] sm:$0xff] }
   0x8   :  { %58 = vmatpush.msra.mxu0 %v32_v8  ;;  %102 = vmatpush.msra.mxu1 %v83_v11  ;;  %v122_v14 = vld [vmem:[%s354_s3 + $0x20] sm:$0xff]  ;;  %v80_v17 = vld [vmem:[%s353_s2 + $0x10] sm:$0xff]  ;;  %v79_v19 = vld [vmem:[%s353_s2 + $0x8] sm:$0xff] }
   0x9   :  { %177 = vmatmul.msk.f32.vlgmr.msra.gmra.mxu0 %vm36_vm1, %v30_v9  ;;  %136 = vmatpush.msra.mxu2 %v123_v12  ;;  %v120_v18 = vld [vmem:[%s354_s3 + $0x10] sm:$0xff]  ;;  %v119_v20 = vld [vmem:[%s354_s3 + $0x8] sm:$0xff]  ;;  %v78_v21 = vld [vmem:[%s353_s2] sm:$0xff]  ;;  %s222_s2 = smov [#allocation3]  }
   0xa   :  { %185 = vmatpush.msra.mxu3 %v83_v11  ;;  %103 = vmatpush.msra.mxu1 %v82_v13  ;;  %v118_v22 = vld [vmem:[%s354_s3] sm:$0xff]  ;;  %v29_v26 = vld [vmem:[#allocation2 + $0x8] sm:$0xff]  ;;  %s155_s3 = sshll.u32 %s222_s2, 4  ;;  %s156_s3 = int_to_ptr.vmem [resolvable:$true] %s155_s3 }
   0xb   :  { %137 = vmatpush.msra.mxu2 %v122_v14  ;;  %v28_v23 = vld [vmem:[#allocation2] sm:$0xff] }
   0xc   :  { %186 = vmatpush.msra.mxu3 %v82_v13  ;;  %104 = vmatpush.msra.mxu1 %v81_v15 }
   0xd   :  { %138 = vmatpush.msra.mxu2 %v121_v16 }
   0xe   :  { %187 = vmatpush.msra.mxu3 %v81_v15  ;;  %105 = vmatpush.msra.mxu1 %v80_v17 }
   0xf   :  { %139 = vmatpush.msra.mxu2 %v120_v18 }
  0x10   :  { %188 = vmatpush.msra.mxu3 %v80_v17  ;;  %106 = vmatpush.msra.mxu1 %v79_v19 }
  0x11   :  { %178 = vmatmul.msk.f32.gmra.mxu0 %vm36_vm1, %v31_v10  ;;  %140 = vmatpush.msra.mxu2 %v119_v20 }
  0x12   :  { %189 = vmatpush.msra.mxu3 %v79_v19  ;;  %107 = vmatpush.msra.mxu1 %v78_v21 }
  0x13   :  { %141 = vmatpush.msra.mxu2 %v118_v22 }
  0x14   :  { %190 = vmatpush.msra.mxu3 %v78_v21 }
  0x86   :  { %v60_v24 = vpop.f32.mrf.mxu0 }
  0x87   :  { %v66_v25 = vadd.f32 %v60_v24, %v28_v23 }
  0x89   :  { %69 = vst.msk [vmem:[#allocation2] sm:$0xff] %vm25_vm0, %v66_v25 }
  0x8e   :  { %v63_v27 = vpop.f32.mrf.mxu0 }
  0x8f   :  { %v67_v28 = vadd.f32 %v63_v27, %v29_v26 }
  0x90   :  { %v74_v29 = vld [vmem:[#allocation2] sm:$0xff] }
  0x91   :  { %70 = vst.msk [vmem:[#allocation2 + $0x8] sm:$0xff] %vm25_vm0, %v67_v28  ;;  %179 = vmatmul.msk.f32.vlgmr.msra.gmra.mxu1 %vm25_vm0, %v74_v29  ;;  %181 = vmatmul.msk.f32.vlgmr.msra.gmra.mxu2 %vm25_vm0, %v74_v29 }
  0x92   :  { %76 = vst.msk [vmem:[#allocation3] sm:$0xff] %vm25_vm0, %v74_v29 }
  0x98   :  { %v75_v30 = vld [vmem:[#allocation2 + $0x8] sm:$0xff] }
  0x99   :  { %77 = vst.msk [vmem:[#allocation3 + $0x8] sm:$0xff] %vm25_vm0, %v75_v30  ;;  %180 = vmatmul.msk.f32.vlgmr.msra.gmra.mxu3 %vm25_vm0, %v75_v30  ;;  %182 = vmatmul.msk.f32.gmra.mxu2 %vm25_vm0, %v75_v30 }
  0x9a   :  { %163 = dma.vmem_to_hbm [thread:$0]  %s156_s3, 256, %s158_s17, [#allocation4], %s223_s1, %s223_s1, %s224_s18  }
 0x10e   :  { %v109_v31 = vpop.f32.mrf.mxu1 }
 0x10f   :  { %116 = vst.msk [vmem:[%s356_s5] sm:$0xff] %vm115_vm2, %v109_v31 }
 0x114   :  { %v143_v32 = vpop.f32.mrf.mxu2 }
 0x115   :  { %149 = vst.msk [vmem:[%s357_s6] sm:$0xff] %vm115_vm2, %v143_v32 }
 0x11c   :  { %v112_v33 = vpop.f32.mrf.mxu3  ;;  %v146_v34 = vpop.f32.mrf.mxu2 }
 0x11d   :  { %117 = vst.msk [vmem:[%s356_s5 + $0x8] sm:$0xff] %vm115_vm2, %v112_v33 }
 0x11e   :  { %150 = vst.msk [vmem:[%s357_s6 + $0x8] sm:$0xff] %vm115_vm2, %v146_v34 }
 0x11f   :  { %219 = dma.done.wait [#allocation4], 256  }
 0x120   :  { %220 = vsyncadd [#allocation4], 4294967040 }
 0x121   :  { %176 = vsyncpa [#allocation4], 1 }

</bundles_post_ra>
